<compile_context>
chip_gen: v7x
topology: tpu7x:2x2x1
jax: 0.10.0
libtpu: 0.0.40
codegen_flags: <defaults>
</compile_context>

<pallas_src>
import jax
import jax.numpy as jnp
from jax.experimental import pallas as pl
from jax.experimental.pallas import tpu as pltpu

BN_EPS = 1e-5


def _round_up(n, m):
    return ((n + m - 1) // m) * m


def _choose_tiling(batch, tb_max):
    """Pick (tile_width, padded_batch, num_tiles).

    * tile width is a multiple of 128 (lane-dense stores),
    * whenever the batch spans more than one 128-lane tile the grid has >= 2
      steps and an even length, so v7x's two TensorCores get a balanced split,
    * tile width is otherwise as large as possible (<= tb_max) to amortize the
      per-grid-step pipeline overhead.
    """
    b128 = _round_up(batch, 128)
    if b128 <= 128:
        return 128, 128, 1
    n = -(-b128 // tb_max)        # tiles needed at the maximum width
    n = max(n, 2)                 # >= 2 grid steps so both v7x TCs are used
    if n % 2:
        n += 1                    # even grid => balanced megacore split
    tile = _round_up(-(-b128 // n), 128)
    return tile, n * tile, n


def post_classifier_kernel(x_ref,
                           w1_ref, b1_ref,
                           w2_ref, b2_ref,
                           w3_ref, b3_ref,
                           wf_ref, bf_ref,
                           o_ref):
    """Fused MLP forward on one batch tile.

    x_ref : [TB, F_in]  natural [batch, feature] layout (f32, streamed)
    w1_ref: [64, F_in]  compute dtype (BN1 folded in)
    w2_ref: [32, 64], w3_ref: [16, 32]  f32 (BN2/BN3 folded in)
    bN_ref: [out, 1]    f32 (BN folded in)
    wf_ref: [16, 1], bf_ref: [1, 1]  f32
    o_ref : [1, TB]     f32 (lane-dense output row)
    """
    # fc1 (+folded BN1) -> ReLU   (drop_1 = identity in eval mode)
    # Contract both operands over F_in (transposed-RHS matmul, native on the
    # MXU) so the result lands directly in lane-dense [64, TB] layout without
    # any wrapper-side transpose pass over x.
    x = x_ref[...].astype(w1_ref.dtype)                       # [TB, F_in]
    h = jax.lax.dot_general(
        w1_ref[...], x, (((1,), (1,)), ((), ())),
        preferred_element_type=jnp.float32) + b1_ref[...]
    h = jnp.maximum(h, 0.0)                                   # [64, TB] f32

    # fc2 (+folded BN2) -> ReLU   (drop_2 = identity in eval mode)
    h = jnp.dot(w2_ref[...], h, preferred_element_type=jnp.float32) + b2_ref[...]
    h = jnp.maximum(h, 0.0)                                   # [32, TB] f32

    # fc3 (+folded BN3) -> ReLU   (drop_3 = identity in eval mode)
    h = jnp.dot(w3_ref[...], h, preferred_element_type=jnp.float32) + b3_ref[...]
    h = jnp.maximum(h, 0.0)                                   # [16, TB] f32

    # final 16 -> 1: VPU multiply + sublane (XLU) reduce instead of an N=1 MXU
    # matmul; the stored output row stays fully lane-dense.
    o_ref[...] = jnp.sum(wf_ref[...] * h, axis=0, keepdims=True) + bf_ref[...]


def post_classifier(x, layers, final, *, compute_dtype=jnp.bfloat16, tb=4096):
    """x: [B, F_in] float. layers: 3x (W[out,in], b, gamma, beta, mean, var).
    final: (Wf[1,16], bf[1]). Returns [B, 1] float32 (eval-mode semantics)."""
    assert tb % 128 == 0, "batch tile must be a multiple of the 128 lanes"
    B, f_in = x.shape

    # ---- fold BatchNorm into the preceding Linear (wrapper-side, f32) ----
    # Only the largest weight (layer 1) is cast to the compute dtype; layers
    # 2/3 stay f32 (tiny, resident in VMEM, keeps in-kernel activations f32).
    params = []
    for li, (w, b, g, be, m, v) in enumerate(layers):
        scale = g * jax.lax.rsqrt(v + BN_EPS)                       # [out]
        w_dt = compute_dtype if li == 0 else jnp.float32
        w_f = (w * scale[:, None]).astype(w_dt)                     # [out, in]
        b_f = ((b - m) * scale + be).astype(jnp.float32)[:, None]   # [out, 1]
        params += [w_f, b_f]
    w_fin, b_fin = final
    params += [w_fin.reshape(-1, 1).astype(jnp.float32),            # [16, 1]
               b_fin.reshape(1, 1).astype(jnp.float32)]             # [1, 1]

    # ---- tiling: big lane-dense batch tiles, even grid for v7x megacore ----
    tb_eff, b_pad, num_tiles = _choose_tiling(B, tb)
    x_pad = x if b_pad == B else jnp.pad(x, ((0, b_pad - B), (0, 0)))

    # ---- specs ----
    if num_tiles > 3:
        # 3-deep input pipeline hides DMA issue latency on longer grids.
        x_spec = pl.BlockSpec((tb_eff, f_in), lambda i: (i, 0),
                              pipeline_mode=pl.Buffered(3))
        x_bufs = 3
    else:
        x_spec = pl.BlockSpec((tb_eff, f_in), lambda i: (i, 0))
        x_bufs = 2
    in_specs = [x_spec]
    # Tiny folded params stay resident across the grid (constant index_map).
    in_specs += [pl.BlockSpec(p.shape, lambda i: (0, 0)) for p in params]
    out_spec = pl.BlockSpec((1, tb_eff), lambda i: (0, i))

    # ---- VMEM budget check (v7x has 64 MiB physical / 32 MiB scoped) ----
    param_bytes = sum(int(p.size) * p.dtype.itemsize for p in params)
    est_vmem = (x_bufs * tb_eff * f_in * x_pad.dtype.itemsize   # streamed x tiles
                + (64 + 32 + 16) * tb_eff * 4                   # f32 intermediates
                + 2 * tb_eff * 4                                 # output row (x2)
                + 2 * param_bytes)                               # resident params
    assert est_vmem < 28 * 1024 * 1024, f"VMEM budget exceeded: {est_vmem} bytes"

    flops = 2 * b_pad * (f_in * 64 + 64 * 32 + 32 * 16 + 16)
    bytes_accessed = (int(x_pad.size) * x_pad.dtype.itemsize
                      + param_bytes + b_pad * 4)

    out_t = pl.pallas_call(
        post_classifier_kernel,
        out_shape=jax.ShapeDtypeStruct((1, b_pad), jnp.float32),
        grid=(num_tiles,),
        in_specs=in_specs,
        out_specs=out_spec,
        compiler_params=pltpu.CompilerParams(
            dimension_semantics=("parallel",),      # shard batch on v7x's 2 TCs
            vmem_limit_bytes=32 * 1024 * 1024),     # safe on v5e/v6e/v7x
        cost_estimate=pl.CostEstimate(flops=flops, transcendentals=0,
                                      bytes_accessed=bytes_accessed),
    )(x_pad, *params)

    return out_t[0, :B].reshape(B, 1)


def init_params(input_size, key):
    """PyTorch-layout parameters (W: [out, in]); BN stats non-trivial so the
    BN-folding path is actually exercised."""
    dims = [(input_size, 64), (64, 32), (32, 16)]
    layers = []
    for i, (fin, fout) in enumerate(dims):
        ks = jax.random.split(jax.random.fold_in(key, i), 6)
        bound = 1.0 / (fin ** 0.5)
        w = jax.random.uniform(ks[0], (fout, fin), jnp.float32, -bound, bound)
        b = jax.random.uniform(ks[1], (fout,), jnp.float32, -bound, bound)
        gamma = jax.random.uniform(ks[2], (fout,), jnp.float32, 0.5, 1.5)
        beta = 0.1 * jax.random.normal(ks[3], (fout,), jnp.float32)
        mean = 0.1 * jax.random.normal(ks[4], (fout,), jnp.float32)
        var = jax.random.uniform(ks[5], (fout,), jnp.float32, 0.5, 1.5)
        layers.append((w, b, gamma, beta, mean, var))
    kf = jax.random.split(jax.random.fold_in(key, 99), 2)
    bound = 1.0 / (16 ** 0.5)
    w_fin = jax.random.uniform(kf[0], (1, 16), jnp.float32, -bound, bound)
    b_fin = jax.random.uniform(kf[1], (1,), jnp.float32, -bound, bound)
    return layers, (w_fin, b_fin)


def reference(x, layers, final):
    """Plain-JAX f32 reference with PyTorch semantics (unfused eval-mode BN)."""
    h = x.astype(jnp.float32)
    for (w, b, g, be, m, v) in layers:
        h = h @ w.T + b
        h = (h - m) / jnp.sqrt(v + BN_EPS) * g + be
        h = jnp.maximum(h, 0.0)
    w_fin, b_fin = final
    return h @ w_fin.T + b_fin


if __name__ == "__main__":
    key = jax.random.PRNGKey(0)
    INPUT_SIZE = 32
    layers, final = init_params(INPUT_SIZE, key)

    # 1) f32 compute, single 128-lane tile (B=8): plumbing + BN-folding check.
    x_small = jax.random.normal(jax.random.fold_in(key, 1), (8, INPUT_SIZE),
                                jnp.float32)
    out_f32 = jax.block_until_ready(
        post_classifier(x_small, layers, final, compute_dtype=jnp.float32))
    ref_f32 = reference(x_small, layers, final)
    assert out_f32.shape == (8, 1)
    assert jnp.allclose(out_f32, ref_f32, atol=1e-4, rtol=1e-4), (out_f32, ref_f32)

    # 2) bf16 layer-1 path, default large tile: B=300 -> 2 even tiles of 256
    #    (balanced v7x grid) with batch padding.
    x_mid = jax.random.normal(jax.random.fold_in(key, 2), (300, INPUT_SIZE),
                              jnp.float32)
    out_bf16 = jax.block_until_ready(post_classifier(x_mid, layers, final))
    ref_mid = reference(x_mid, layers, final)
    assert out_bf16.shape == (300, 1)
    assert jnp.allclose(out_bf16, ref_mid, atol=5e-2, rtol=5e-2)

    # 3) f32, forced small tile: B=1000, tb=128 -> 8-step grid exercising the
    #    3-deep buffered x pipeline and the streaming/padded path.
    x_big = jax.random.normal(jax.random.fold_in(key, 3), (1000, INPUT_SIZE),
                              jnp.float32)
    out_big = jax.block_until_ready(
        post_classifier(x_big, layers, final, compute_dtype=jnp.float32, tb=128))
    ref_big = reference(x_big, layers, final)
    assert out_big.shape == (1000, 1)
    assert jnp.allclose(out_big, ref_big, atol=1e-4, rtol=1e-4)

    print("KERNEL_OK")
</pallas_src>

<mosaic_0001>
module attributes {stable_mosaic.version = 11 : i64} {
  func.func @post_classifier_kernel(%arg0: i32, %arg1: memref<128x32xf32, #tpu.memory_space<vmem>>, %arg2: memref<64x32xf32, #tpu.memory_space<vmem>>, %arg3: memref<64x1xf32, #tpu.memory_space<vmem>>, %arg4: memref<32x64xf32, #tpu.memory_space<vmem>>, %arg5: memref<32x1xf32, #tpu.memory_space<vmem>>, %arg6: memref<16x32xf32, #tpu.memory_space<vmem>>, %arg7: memref<16x1xf32, #tpu.memory_space<vmem>>, %arg8: memref<16x1xf32, #tpu.memory_space<vmem>>, %arg9: memref<1x1xf32, #tpu.memory_space<vmem>>, %arg10: memref<1x128xf32, #tpu.memory_space<vmem>>) attributes {dimension_semantics = [#tpu.dimension_semantics<parallel>], iteration_bounds = array<i64: 1>, scalar_prefetch = 0 : i64, scratch_operands = 0 : i64, tpu.core_type = #tpu.core_type<tc>, window_params = [{transform_indices = @transform_0, window_bounds = array<i64: 128, 32>}, {pipeline_mode = #tpu.pipeline_mode<synchronous>, transform_indices = @transform_1, window_bounds = array<i64: 64, 32>}, {pipeline_mode = #tpu.pipeline_mode<synchronous>, transform_indices = @transform_2, window_bounds = array<i64: 64, 1>}, {pipeline_mode = #tpu.pipeline_mode<synchronous>, transform_indices = @transform_3, window_bounds = array<i64: 32, 64>}, {pipeline_mode = #tpu.pipeline_mode<synchronous>, transform_indices = @transform_4, window_bounds = array<i64: 32, 1>}, {pipeline_mode = #tpu.pipeline_mode<synchronous>, transform_indices = @transform_5, window_bounds = array<i64: 16, 32>}, {pipeline_mode = #tpu.pipeline_mode<synchronous>, transform_indices = @transform_6, window_bounds = array<i64: 16, 1>}, {pipeline_mode = #tpu.pipeline_mode<synchronous>, transform_indices = @transform_7, window_bounds = array<i64: 16, 1>}, {pipeline_mode = #tpu.pipeline_mode<synchronous>, transform_indices = @transform_8, window_bounds = array<i64: 1, 1>}, {transform_indices = @transform_9, window_bounds = array<i64: 1, 128>}]} {
    %c0 = arith.constant 0 : index
    %c0_0 = arith.constant 0 : index
    %0 = vector.load %arg1[%c0, %c0_0] : memref<128x32xf32, #tpu.memory_space<vmem>>, vector<128x32xf32>
    %c0_1 = arith.constant 0 : index
    %c0_2 = arith.constant 0 : index
    %1 = vector.load %arg2[%c0_1, %c0_2] : memref<64x32xf32, #tpu.memory_space<vmem>>, vector<64x32xf32>
    %cst = arith.constant dense<0.000000e+00> : vector<64x128xf32>
    %2 = tpu.matmul %1, %0, %cst {dimension_numbers = #tpu.dot_dimension_numbers<[1], [1], [0], [0], [0, 0, 1, 0], [], []>} : vector<64x32xf32>, vector<128x32xf32>, vector<64x128xf32> -> vector<64x128xf32>
    %c0_3 = arith.constant 0 : index
    %c0_4 = arith.constant 0 : index
    %3 = vector.load %arg3[%c0_3, %c0_4] : memref<64x1xf32, #tpu.memory_space<vmem>>, vector<64x1xf32>
    %4 = vector.broadcast %3 : vector<64x1xf32> to vector<64x128xf32>
    %5 = arith.addf %2, %4 : vector<64x128xf32>
    %cst_5 = arith.constant 0.000000e+00 : f32
    %6 = vector.broadcast %cst_5 : f32 to vector<64x128xf32>
    %7 = arith.maximumf %5, %6 : vector<64x128xf32>
    %c0_6 = arith.constant 0 : index
    %c0_7 = arith.constant 0 : index
    %8 = vector.load %arg4[%c0_6, %c0_7] : memref<32x64xf32, #tpu.memory_space<vmem>>, vector<32x64xf32>
    %cst_8 = arith.constant dense<0.000000e+00> : vector<32x128xf32>
    %9 = tpu.matmul %8, %7, %cst_8 {dimension_numbers = #tpu.dot_dimension_numbers<[1], [0], [0], [1], [0, 0, 1, 1], [], []>} : vector<32x64xf32>, vector<64x128xf32>, vector<32x128xf32> -> vector<32x128xf32>
    %c0_9 = arith.constant 0 : index
    %c0_10 = arith.constant 0 : index
    %10 = vector.load %arg5[%c0_9, %c0_10] : memref<32x1xf32, #tpu.memory_space<vmem>>, vector<32x1xf32>
    %11 = vector.broadcast %10 : vector<32x1xf32> to vector<32x128xf32>
    %12 = arith.addf %9, %11 : vector<32x128xf32>
    %cst_11 = arith.constant 0.000000e+00 : f32
    %13 = vector.broadcast %cst_11 : f32 to vector<32x128xf32>
    %14 = arith.maximumf %12, %13 : vector<32x128xf32>
    %c0_12 = arith.constant 0 : index
    %c0_13 = arith.constant 0 : index
    %15 = vector.load %arg6[%c0_12, %c0_13] : memref<16x32xf32, #tpu.memory_space<vmem>>, vector<16x32xf32>
    %cst_14 = arith.constant dense<0.000000e+00> : vector<16x128xf32>
    %16 = tpu.matmul %15, %14, %cst_14 {dimension_numbers = #tpu.dot_dimension_numbers<[1], [0], [0], [1], [0, 0, 1, 1], [], []>} : vector<16x32xf32>, vector<32x128xf32>, vector<16x128xf32> -> vector<16x128xf32>
    %c0_15 = arith.constant 0 : index
    %c0_16 = arith.constant 0 : index
    %17 = vector.load %arg7[%c0_15, %c0_16] : memref<16x1xf32, #tpu.memory_space<vmem>>, vector<16x1xf32>
    %18 = vector.broadcast %17 : vector<16x1xf32> to vector<16x128xf32>
    %19 = arith.addf %16, %18 : vector<16x128xf32>
    %cst_17 = arith.constant 0.000000e+00 : f32
    %20 = vector.broadcast %cst_17 : f32 to vector<16x128xf32>
    %21 = arith.maximumf %19, %20 : vector<16x128xf32>
    %c0_18 = arith.constant 0 : index
    %c0_19 = arith.constant 0 : index
    %22 = vector.load %arg8[%c0_18, %c0_19] : memref<16x1xf32, #tpu.memory_space<vmem>>, vector<16x1xf32>
    %23 = vector.broadcast %22 : vector<16x1xf32> to vector<16x128xf32>
    %24 = arith.mulf %23, %21 : vector<16x128xf32>
    %cst_20 = arith.constant dense<0.000000e+00> : vector<128xf32>
    %25 = vector.multi_reduction <add>, %24, %cst_20 [0] : vector<16x128xf32> to vector<128xf32>
    %26 = vector.shape_cast %25 : vector<128xf32> to vector<1x128xf32>
    %c0_21 = arith.constant 0 : index
    %c0_22 = arith.constant 0 : index
    %27 = vector.load %arg9[%c0_21, %c0_22] : memref<1x1xf32, #tpu.memory_space<vmem>>, vector<1x1xf32>
    %28 = vector.broadcast %27 : vector<1x1xf32> to vector<1x128xf32>
    %29 = arith.addf %26, %28 : vector<1x128xf32>
    %c0_23 = arith.constant 0 : index
    %c0_24 = arith.constant 0 : index
    %30 = vector.load %arg10[%c0_23, %c0_24] : memref<1x128xf32, #tpu.memory_space<vmem>>, vector<1x128xf32>
    tpu.vector_store %arg10[%c0_23, %c0_24], %29 {strides = array<i32>} : memref<1x128xf32, #tpu.memory_space<vmem>>, vector<1x128xf32>,
    return
  }
  func.func @transform_0(%arg0: i32) -> (i32, i32) {
    %c0_i32 = arith.constant 0 : i32
    %c0_i32_0 = arith.constant 0 : i32
    return %arg0, %c0_i32 : i32, i32
  }
  func.func @transform_1(%arg0: i32) -> (i32, i32) {
    %c0_i32 = arith.constant 0 : i32
    %c0_i32_0 = arith.constant 0 : i32
    %c0_i32_1 = arith.constant 0 : i32
    return %c0_i32, %c0_i32_0 : i32, i32
  }
  func.func @transform_2(%arg0: i32) -> (i32, i32) {
    %c0_i32 = arith.constant 0 : i32
    %c0_i32_0 = arith.constant 0 : i32
    %c0_i32_1 = arith.constant 0 : i32
    return %c0_i32, %c0_i32_0 : i32, i32
  }
  func.func @transform_3(%arg0: i32) -> (i32, i32) {
    %c0_i32 = arith.constant 0 : i32
    %c0_i32_0 = arith.constant 0 : i32
    %c0_i32_1 = arith.constant 0 : i32
    return %c0_i32, %c0_i32_0 : i32, i32
  }
  func.func @transform_4(%arg0: i32) -> (i32, i32) {
    %c0_i32 = arith.constant 0 : i32
    %c0_i32_0 = arith.constant 0 : i32
    %c0_i32_1 = arith.constant 0 : i32
    return %c0_i32, %c0_i32_0 : i32, i32
  }
  func.func @transform_5(%arg0: i32) -> (i32, i32) {
    %c0_i32 = arith.constant 0 : i32
    %c0_i32_0 = arith.constant 0 : i32
    %c0_i32_1 = arith.constant 0 : i32
    return %c0_i32, %c0_i32_0 : i32, i32
  }
  func.func @transform_6(%arg0: i32) -> (i32, i32) {
    %c0_i32 = arith.constant 0 : i32
    %c0_i32_0 = arith.constant 0 : i32
    %c0_i32_1 = arith.constant 0 : i32
    return %c0_i32, %c0_i32_0 : i32, i32
  }
  func.func @transform_7(%arg0: i32) -> (i32, i32) {
    %c0_i32 = arith.constant 0 : i32
    %c0_i32_0 = arith.constant 0 : i32
    %c0_i32_1 = arith.constant 0 : i32
    return %c0_i32, %c0_i32_0 : i32, i32
  }
  func.func @transform_8(%arg0: i32) -> (i32, i32) {
    %c0_i32 = arith.constant 0 : i32
    %c0_i32_0 = arith.constant 0 : i32
    %c0_i32_1 = arith.constant 0 : i32
    return %c0_i32, %c0_i32_0 : i32, i32
  }
  func.func @transform_9(%arg0: i32) -> (i32, i32) {
    %c0_i32 = arith.constant 0 : i32
    %c0_i32_0 = arith.constant 0 : i32
    return %c0_i32, %arg0 : i32, i32
  }
}

</mosaic_0001>

<bundles_post_ra>
// kernel: tpu_custom_call.1
= control target key start
LH: loop header
LB: loop body
LE: loop exit
PB: predicated region body
PF: predicated region fallthrough
CT: control target
= control target key end

     0   :  { %s1073_s0 = inlined_call_operand.vmem [shape: f32[128,32], index: 0, kind: input, shape index: {}]   ;;  %s1074_s1 = inlined_call_operand.vmem [shape: f32[64,32], index: 1, kind: input, shape index: {}]   ;;  %s1075_s2 = inlined_call_operand.vmem [shape: f32[64,1], index: 2, kind: input, shape index: {}]   ;;  %s1076_s3 = inlined_call_operand.vmem [shape: f32[32,64], index: 3, kind: input, shape index: {}]   ;;  %s1077_s4 = inlined_call_operand.vmem [shape: f32[32,1], index: 4, kind: input, shape index: {}]   ;;  %s1078_s5 = inlined_call_operand.vmem [shape: f32[16,32], index: 5, kind: input, shape index: {}]   ;;  %s1079_s6 = inlined_call_operand.vmem [shape: f32[16,1], index: 6, kind: input, shape index: {}]   ;;  %s1080_s7 = inlined_call_operand.vmem [shape: f32[16,1], index: 7, kind: input, shape index: {}]   ;;  %s1081_s8 = inlined_call_operand.<no memory space> [shape: f32[1,1], index: 8, kind: input, shape index: {}]   ;;  %s1082_s9 = inlined_call_operand.hbm [shape: f32[1,128], index: 9, kind: output, shape index: {}]  }
   0x1   :  { %v14_v0 = vstv %s1081_s8 }
   0x2   :  { %15 = vst [vmem:[#allocation2] sm:$0x1] %v14_v0 }
   0x3   :  { %v35_v1 = vld [vmem:[%s1073_s0] sm:$0xff]  ;;  %v36_v2 = vld [vmem:[%s1073_s0 + $0x8] sm:$0xff]  ;;  %vm107_vm0 = vcmask 261120   ;;  %v37_v3 = vld [vmem:[%s1073_s0 + $0x10] sm:$0xff]  ;;  %v816_v7 = vmov 0  }
   0x4   :  { %v716_v4 = vpack.c.bf16 %v36_v2, %v35_v1  ;;  %vm882_vm1 = vmpackc.low %vm107_vm0, %vm107_vm0  ;;  %v38_v6 = vld [vmem:[%s1073_s0 + $0x18] sm:$0xff]  ;;  %790 = vset.pattern.permute.xlu0 %v816_v7  ;;  %791 = vset.pattern.permute.xlu1 %v816_v7  ;;  %v51_v9 = vld [vmem:[%s1074_s1] sm:$0xff] }
   0x5   :  { %v722_v8 = vpack.c.bf16 %v38_v6, %v37_v3  ;;  %v39_v10 = vld [vmem:[%s1073_s0 + $0x20] sm:$0xff]  ;;  %v40_v11 = vld [vmem:[%s1073_s0 + $0x28] sm:$0xff]  ;;  %671 = vmatprep.mubr.msk.f32.mxu0 %vm107_vm0, %v51_v9  ;;  %v61_v14 = vld [vmem:[%s1075_s2 + $0x10] sm:$0xff] }
   0x6   :  { %718 = vmatprep.subr.msk.bf16.mxu0 %vm882_vm1, %v716_v4  ;;  %v59_v12 = vld [vmem:[%s1075_s2] sm:$0xff]  ;;  %v728_v13 = vpack.c.bf16 %v40_v11, %v39_v10  ;;  %v60_v15 = vld [vmem:[%s1075_s2 + $0x8] sm:$0xff]  ;;  %79 = vperm.xlu1 %791, %v61_v14   ;;  %v62_v16 = vld [vmem:[%s1075_s2 + $0x18] sm:$0xff] }
   0x7   :  { %721 = vmatpush3.bf16.xpose.msk.msra.mxu0 %vm882_vm1, %v716_v4  ;;  %69 = vperm.xlu0 %790, %v59_v12   ;;  %v41_v17 = vld [vmem:[%s1073_s0 + $0x30] sm:$0xff]  ;;  %v42_v18 = vld [vmem:[%s1073_s0 + $0x38] sm:$0xff]  ;;  %v63_v19 = vld [vmem:[%s1075_s2 + $0x20] sm:$0xff] }
   0x8   :  { %724 = vmatprep.subr.msk.bf16.mxu0 %vm882_vm1, %v722_v8 }
   0xa   :  { %84 = vperm.xlu1 %791, %v62_v16  }
   0xb   :  { %74 = vperm.xlu0 %790, %v60_v15  }
   0xf   :  { %727 = vmatpush3.bf16.xpose.msk.msra.mxu0 %vm882_vm1, %v722_v8 }
  0x10   :  { %730 = vmatprep.subr.msk.bf16.mxu0 %vm882_vm1, %v728_v13 }
  0x11   :  { %16 = vsyncpa [#allocation4], 0  ;;  %v64_v20 = vld [vmem:[%s1075_s2 + $0x28] sm:$0xff]  ;;  %v734_v21 = vpack.c.bf16 %v42_v18, %v41_v17  ;;  %89 = vperm.xlu0 %790, %v63_v19   ;;  %v65_v22 = vld [vmem:[%s1075_s2 + $0x30] sm:$0xff]  ;;  %vm321_vm2 = vcmask 523264  }
  0x12   :  { %94 = vperm.xlu1 %791, %v64_v20   ;;  %v66_v23 = vld [vmem:[%s1075_s2 + $0x38] sm:$0xff]  ;;  %v43_v24 = vld [vmem:[%s1073_s0 + $0x40] sm:$0xff]  ;;  %v44_v25 = vld [vmem:[%s1073_s0 + $0x48] sm:$0xff] }
  0x13   :  { %v297_v26 = vld [vmem:[%s1077_s4] sm:$0xff]  ;;  %v298_v27 = vld [vmem:[%s1077_s4 + $0x8] sm:$0xff]  ;;  %v740_v28 = vpack.c.bf16 %v44_v25, %v43_v24  ;;  %v299_v29 = vld [vmem:[%s1077_s4 + $0x10] sm:$0xff] }
  0x14   :  { %v300_v30 = vld [vmem:[%s1077_s4 + $0x18] sm:$0xff]  ;;  %v45_v31 = vld [vmem:[%s1073_s0 + $0x50] sm:$0xff]  ;;  %v425_v33 = vld [vmem:[%s1079_s6] sm:$0xff] }
  0x15   :  { %99 = vperm.xlu0 %790, %v65_v22   ;;  %v46_v32 = vld [vmem:[%s1073_s0 + $0x58] sm:$0xff]  ;;  %v426_v34 = vld [vmem:[%s1079_s6 + $0x8] sm:$0xff]  ;;  %v520_v36 = vld [vmem:[%s1080_s7] sm:$0xff] }
  0x16   :  { %104 = vperm.xlu1 %791, %v66_v23   ;;  %v746_v35 = vpack.c.bf16 %v46_v32, %v45_v31  ;;  %v521_v37 = vld [vmem:[%s1080_s7 + $0x8] sm:$0xff]  ;;  %v47_v38 = vld [vmem:[%s1073_s0 + $0x60] sm:$0xff]  ;;  %v49_v42 = vld [vmem:[%s1073_s0 + $0x70] sm:$0xff] }
  0x17   :  { %733 = vmatpush3.bf16.xpose.msk.msra.mxu0 %vm882_vm1, %v728_v13  ;;  %v48_v39 = vld [vmem:[%s1073_s0 + $0x68] sm:$0xff]  ;;  %v541_v40 = vld [vmem:[#allocation2] sm:$0x1]  ;;  %v50_v43 = vld [vmem:[%s1073_s0 + $0x78] sm:$0xff] }
  0x18   :  { %736 = vmatprep.subr.msk.bf16.mxu0 %vm882_vm1, %v734_v21  ;;  %v752_v41 = vpack.c.bf16 %v48_v39, %v47_v38  ;;  %v758_v44 = vpack.c.bf16 %v50_v43, %v49_v42  ;;  %v52_v45 = vld [vmem:[%s1074_s1 + $0x8] sm:$0xff]  ;;  %v53_v46 = vld [vmem:[%s1074_s1 + $0x10] sm:$0xff]  ;;  %v54_v47 = vld [vmem:[%s1074_s1 + $0x18] sm:$0xff] }
  0x19   :  { %303 = vperm.xlu0 %790, %v297_v26   ;;  %v55_v48 = vld [vmem:[%s1074_s1 + $0x20] sm:$0xff]  ;;  %v56_v49 = vld [vmem:[%s1074_s1 + $0x28] sm:$0xff]  ;;  %v57_v50 = vld [vmem:[%s1074_s1 + $0x30] sm:$0xff] }
  0x1a   :  { %308 = vperm.xlu1 %791, %v298_v27   ;;  %v58_v51 = vld [vmem:[%s1074_s1 + $0x38] sm:$0xff]  ;;  %v293_v52 = vld [vmem:[%s1076_s3] sm:$0xff]  ;;  %v294_v25 = vld [vmem:[%s1076_s3 + $0x8] sm:$0xff] }
  0x1b   :  { %699 = vmatprep.mubr.msk.f32.mxu1 %vm321_vm2, %v293_v52  ;;  %v295_v26 = vld [vmem:[%s1076_s3 + $0x10] sm:$0xff]  ;;  %v296_v27 = vld [vmem:[%s1076_s3 + $0x18] sm:$0xff] }
  0x1d   :  { %313 = vperm.xlu0 %790, %v299_v29  }
  0x1e   :  { %318 = vperm.xlu1 %791, %v300_v30  }
  0x1f   :  { %739 = vmatpush3.bf16.xpose.msk.msra.mxu0 %vm882_vm1, %v734_v21 }
  0x20   :  { %742 = vmatprep.subr.msk.bf16.mxu0 %vm882_vm1, %v740_v28 }
  0x21   :  { %429 = vperm.xlu0 %790, %v425_v33  }
  0x22   :  { %434 = vperm.xlu1 %791, %v426_v34  }
  0x25   :  { %524 = vperm.xlu0 %790, %v520_v36  }
  0x26   :  { %529 = vperm.xlu1 %791, %v521_v37  }
  0x27   :  { %745 = vmatpush3.bf16.xpose.msk.msra.mxu0 %vm882_vm1, %v740_v28  ;;  %v423_v28 = vld [vmem:[%s1078_s5] sm:$0xff] }
  0x28   :  { %748 = vmatprep.subr.msk.bf16.mxu0 %vm882_vm1, %v746_v35 }
  0x29   :  { %544 = vperm.xlu0 %790, %v541_v40  }
  0x2f   :  { %751 = vmatpush3.bf16.xpose.msk.msra.mxu0 %vm882_vm1, %v746_v35 }
  0x30   :  { %754 = vmatprep.subr.msk.bf16.mxu0 %vm882_vm1, %v752_v41 }
  0x37   :  { %757 = vmatpush3.bf16.xpose.msk.msra.mxu0 %vm882_vm1, %v752_v41 }
  0x38   :  { %760 = vmatprep.subr.msk.bf16.mxu0 %vm882_vm1, %v758_v44 }
  0x3f   :  { %763 = vmatpush3.bf16.xpose.msk.msra.mxu0 %vm882_vm1, %v758_v44 }
  0x46   :  { %672 = vmatmul.mubr.msk.f32.vlgmr.msra.gmra.mrb[0].mxu0 %vm107_vm0, %v52_v45 }
  0x47   :  { %674 = vmatprep.mubr.msk.f32.mxu0 %vm107_vm0, %v53_v46 }
  0x4a   :  { %675 = vmatmul.mubr.msk.f32.gmra.mrb[2].mxu0 %vm107_vm0, %v54_v47  ;;  %v424_v47 = vld [vmem:[%s1078_s5 + $0x8] sm:$0xff]  ;;  %s817_s5 = smov [#allocation3]  }
  0x4b   :  { %677 = vmatprep.mubr.msk.f32.mxu0 %vm107_vm0, %v55_v48  ;;  %s559_s25 = sshll.u32 %s817_s5, 4  ;;  %s560_s25 = int_to_ptr.vmem [resolvable:$true] %s559_s25 }
  0x4c   :  { %s792_s26 = scalar_lea.vmem %s560_s25, 16  ;;  %s796_s27 = scalar_lea.vmem %s560_s25, 32 }
  0x4d   :  { %p793_p0 = scmp.ne.s32.totalorder %s560_s25, %s792_s26  ;;  %p797_p1 = scmp.lt.s32.totalorder %s560_s25, %s560_s25 }
  0x4e   :  { %678 = vmatmul.mubr.msk.f32.gmra.mrb[4].mxu0 %vm107_vm0, %v56_v49  ;;  %p798_p2 = scmp.lt.s32.totalorder %s796_s27, %s792_s26 }
  0x4f   :  { %680 = vmatprep.mubr.msk.f32.mxu0 %vm107_vm0, %v57_v50 }
  0x50   :  { %p799_p3 = por %p798_p2, %p797_p1 }
  0x52   :  { %681 = vmatmul.mubr.msk.f32.gmra.mrb[6].mxu0 %vm107_vm0, %v58_v51  ;;  %p800_p4 = pnand %p799_p3, %p793_p0 }
  0x85   :  { %v80_v54 = vpop.permute.xlu1 %79 }
  0x86   :  { %v70_v53 = vpop.permute.xlu0 %69 }
  0x89   :  { %v85_v56 = vpop.permute.xlu1 %84 }
  0x8a   :  { %v75_v55 = vpop.permute.xlu0 %74 }
  0x90   :  { %v90_v5 = vpop.permute.xlu0 %89 }
  0x91   :  { %v95_v2 = vpop.permute.xlu1 %94 }
  0x94   :  { %v100_v17 = vpop.permute.xlu0 %99 }
  0x95   :  { %v105_v14 = vpop.permute.xlu1 %104 }
  0x98   :  { %v304_v30 = vpop.permute.xlu0 %303 }
  0x99   :  { %v309_v29 = vpop.permute.xlu1 %308 }
  0x9c   :  { %v314_v39 = vpop.permute.xlu0 %313 }
  0x9d   :  { %v319_v36 = vpop.permute.xlu1 %318 }
  0xa0   :  { %v430_v49 = vpop.permute.xlu0 %429 }
  0xa1   :  { %v435_v48 = vpop.permute.xlu1 %434 }
 0x119   :  { %v673_v57 = vpop.f32.mrb[0].mxu0 }
 0x11a   :  { %v252_v58 = vadd.f32 %v673_v57, %v75_v55  ;;  %v246_v59 = vpop.f32.mrb[1].mxu0  ;;  %v530_v55 = vpop.permute.xlu1 %529 }
 0x11b   :  { %v247_v60 = vadd.f32 %v246_v59, %v70_v53  ;;  %v525_v57 = vpop.permute.xlu0 %524 }
 0x11c   :  { %v286_v61 = vmax.f32 %v252_v58, 0.0 }
 0x11d   :  { %v285_v62 = vmax.f32 %v247_v60, 0.0  ;;  %v676_v63 = vpop.f32.mrb[2].mxu0  ;;  %v547_v60 = vlaneseq }
 0x11e   :  { %v262_v0 = vadd.f32 %v676_v63, %v85_v56  ;;  %v256_v1 = vpop.f32.mrb[3].mxu0 }
 0x11f   :  { %v257_v3 = vadd.f32 %v256_v1, %v80_v54  ;;  %v764_v4 = vpack.c.bf16 %v286_v61, %v285_v62  ;;  %v548_v63 = vshrl.u32 %v547_v60, 7 }
 0x120   :  { %v288_v6 = vmax.f32 %v262_v0, 0.0 }
 0x121   :  { %v287_v7 = vmax.f32 %v257_v3, 0.0  ;;  %v679_v8 = vpop.f32.mrb[4].mxu0  ;;  %765 = vmatprep.subr.bf16.mxu1 %v764_v4 }
 0x122   :  { %v272_v9 = vadd.f32 %v679_v8, %v95_v2  ;;  %v266_v10 = vpop.f32.mrb[5].mxu0  ;;  %767 = vmatpush3.bf16.msra.mxu1 %v764_v4  ;;  %v549_v2 = vsub.s32 0, %v548_v63  ;;  %v545_v4 = vpop.permute.xlu0 %544 }
 0x123   :  { %v768_v11 = vpack.c.bf16 %v288_v6, %v287_v7  ;;  %v267_v12 = vadd.f32 %v266_v10, %v90_v5 }
 0x124   :  { %v290_v13 = vmax.f32 %v272_v9, 0.0  ;;  %v550_v6 = vrot.slane %v545_v4, %v549_v2 }
 0x125   :  { %v289_v15 = vmax.f32 %v267_v12, 0.0  ;;  %v682_v16 = vpop.f32.mrb[6].mxu0  ;;  %769 = vmatprep.subr.bf16.mxu1 %v768_v11 }
 0x126   :  { %v282_v18 = vadd.f32 %v682_v16, %v105_v14  ;;  %v276_v19 = vpop.f32.mrb[7].mxu0  ;;  %771 = vmatpush3.bf16.msra.mxu1 %v768_v11 }
 0x127   :  { %v772_v20 = vpack.c.bf16 %v290_v13, %v289_v15  ;;  %v277_v21 = vadd.f32 %v276_v19, %v100_v17 }
 0x128   :  { %v292_v22 = vmax.f32 %v282_v18, 0.0 }
 0x129   :  { %v291_v23 = vmax.f32 %v277_v21, 0.0  ;;  %773 = vmatprep.subr.bf16.mxu1 %v772_v20 }
 0x12a   :  { %775 = vmatpush3.bf16.msra.mxu1 %v772_v20 }
 0x12b   :  { %v776_v24 = vpack.c.bf16 %v292_v22, %v291_v23 }
 0x12d   :  { %777 = vmatprep.subr.bf16.mxu1 %v776_v24 }
 0x12e   :  { %779 = vmatpush3.bf16.msra.mxu1 %v776_v24 }
 0x131   :  { %700 = vmatmul.mubr.msk.f32.vlgmr.msra.gmra.mrb[0].mxu1 %vm321_vm2, %v294_v25 }
 0x132   :  { %702 = vmatprep.mubr.msk.f32.mxu1 %vm321_vm2, %v295_v26 }
 0x135   :  { %703 = vmatmul.mubr.msk.f32.gmra.mrb[2].mxu1 %vm321_vm2, %v296_v27 }
 0x136   :  { %713 = vmatprep.mubr.msk.f32.mxu1 %vm107_vm0, %v423_v28 }
 0x204   :  { %v701_v31 = vpop.f32.mrb[0].mxu1 }
 0x205   :  { %v406_v32 = vadd.f32 %v701_v31, %v309_v29  ;;  %v400_v33 = vpop.f32.mrb[1].mxu1 }
 0x206   :  { %v401_v34 = vadd.f32 %v400_v33, %v304_v30 }
 0x207   :  { %v420_v35 = vmax.f32 %v406_v32, 0.0 }
 0x208   :  { %v419_v37 = vmax.f32 %v401_v34, 0.0  ;;  %v704_v38 = vpop.f32.mrb[2].mxu1 }
 0x209   :  { %v416_v40 = vadd.f32 %v704_v38, %v319_v36  ;;  %v410_v41 = vpop.f32.mrb[3].mxu1 }
 0x20a   :  { %v780_v42 = vpack.c.bf16 %v420_v35, %v419_v37  ;;  %v411_v43 = vadd.f32 %v410_v41, %v314_v39 }
 0x20b   :  { %v422_v44 = vmax.f32 %v416_v40, 0.0 }
 0x20c   :  { %v421_v45 = vmax.f32 %v411_v43, 0.0  ;;  %781 = vmatprep.subr.bf16.mxu1 %v780_v42 }
 0x20d   :  { %783 = vmatpush3.bf16.msra.mxu1 %v780_v42 }
 0x20e   :  { %v784_v46 = vpack.c.bf16 %v422_v44, %v421_v45 }
 0x210   :  { %785 = vmatprep.subr.bf16.mxu1 %v784_v46 }
 0x211   :  { %787 = vmatpush3.bf16.msra.mxu1 %v784_v46 }
 0x214   :  { %714 = vmatmul.mubr.msk.f32.vlgmr.msra.gmra.mrb[4].mxu1 %vm107_vm0, %v424_v47 }
 0x2e7   :  { %v715_v50 = vpop.f32.mrb[4].mxu1 }
 0x2e8   :  { %v515_v51 = vadd.f32 %v715_v50, %v435_v48  ;;  %v509_v52 = vpop.f32.mrb[5].mxu1 }
 0x2e9   :  { %v510_v53 = vadd.f32 %v509_v52, %v430_v49 }
 0x2ea   :  { %v519_v54 = vmax.f32 %v515_v51, 0.0 }
 0x2eb   :  { %v518_v56 = vmax.f32 %v510_v53, 0.0 }
 0x2ec   :  { %v533_v58 = vmul.f32 %v530_v55, %v519_v54 }
 0x2ed   :  { %v532_v59 = vmul.f32 %v525_v57, %v518_v56 }
 0x2ef   :  { %v534_v61 = vadd.f32 %v533_v58, %v532_v59 }
 0x2f1   :  { %v535_v62 = vrot.slane %v534_v61, 4 }
 0x2f3   :  { %v536_v0 = vadd.f32 %v535_v62, %v534_v61 }
 0x2f5   :  { %v537_v1 = vrot.slane %v536_v0, 2 }
 0x2f7   :  { %v538_v3 = vadd.f32 %v537_v1, %v536_v0 }
 0x2f9   :  { %v539_v5 = vrot.slane %v538_v3, 1 }
 0x2fb   :  { %v540_v7 = vadd.f32 %v539_v5, %v538_v3 }
 0x2fd   :  { %v551_v8 = vadd.f32 %v550_v6, %v540_v7 }
 0x2ff   :  { %552 = vst [vmem:[#allocation3] sm:$0x1] %v551_v8 }
 0x300   :  { %803 = shalt.err (!%p800_p4)
}
 0x301   :  { %s804_s29 = scalar_lea.hbm %s1082_s9, 16 }
 0x302   :  { %p805_p5 = scmp.ne.s32.totalorder %s1082_s9, %s804_s29  ;;  %p808_p6 = scmp.lt.u32.totalorder %s804_s29, %s1082_s9 }
 0x304   :  { %p810_p7 = pnand %p808_p6, %p805_p5 }
 0x306   :  { %813 = shalt.err (!%p810_p7)
}
 0x307   :  { %562 = dma.vmem_to_hbm [thread:$0]  %s560_s25, 16, %s1082_s9, [#allocation4]  }
 0x308   :  { %814 = dma.done.wait [#allocation4], 16  }
 0x309   :  { %815 = vsyncadd [#allocation4], 4294967280 }
 0x30a   :  { %566 = vsyncpa [#allocation4], 1 }

</bundles_post_ra>
